<compile_context>
chip_gen: v5e
topology: v5e:2x2
jax: 0.10.0
libtpu: 0.0.40
codegen_flags: <defaults>
</compile_context>

<pallas_src>
import math
import functools

import jax
import jax.numpy as jnp
from jax import lax
from jax.experimental import pallas as pl
from jax.experimental.pallas import tpu as pltpu


def _mha_kernel(q_ref, k_ref, v_ref, mask_ref,
                wq_ref, wk_ref, wv_ref, wo_ref,
                bq_ref, bk_ref, bv_ref, bo_ref,
                o_ref, *, n_heads, d_k, zero_pad):
    # Per-batch views.
    xq = q_ref[0]            # (seq, d_model)
    xk = k_ref[0]            # (seq, d_model)
    xv = v_ref[0]            # (seq, d_model)
    mask = mask_ref[...]     # (seq, seq)

    # Input projections on the MXU. Weights are stored as (d_in, d_out),
    # i.e. already transposed relative to torch.nn.Linear.weight.
    qp = jnp.dot(xq, wq_ref[...], preferred_element_type=jnp.float32) + bq_ref[...]
    kp = jnp.dot(xk, wk_ref[...], preferred_element_type=jnp.float32) + bk_ref[...]
    vp = jnp.dot(xv, wv_ref[...], preferred_element_type=jnp.float32) + bv_ref[...]

    scale = jnp.float32(1.0 / math.sqrt(d_k))
    neg_big = jnp.float32(-1e32)

    head_outs = []
    for h in range(n_heads):   # static unroll over heads
        lo = h * d_k
        qh = qp[:, lo:lo + d_k]          # (seq, d_k)
        kh = kp[:, lo:lo + d_k]
        vh = vp[:, lo:lo + d_k]

        s = jnp.dot(qh, kh.T, preferred_element_type=jnp.float32) * scale
        s = jnp.where(mask == 0, neg_big, s)

        # Numerically stable softmax along keys.
        m = jnp.max(s, axis=-1, keepdims=True)
        e = jnp.exp(s - m)
        p = e / jnp.sum(e, axis=-1, keepdims=True)

        if zero_pad:
            # torch: scores = cat([zeros(bs,h,1,seq), scores[:,:,1:,:]], dim=2)
            row = lax.broadcasted_iota(jnp.int32, p.shape, 0)
            p = jnp.where(row == 0, jnp.float32(0.0), p)

        head_outs.append(jnp.dot(p, vh, preferred_element_type=jnp.float32))

    # Concatenating per-head outputs along the feature axis reproduces
    # scores.transpose(1, 2).contiguous().view(bs, -1, d_model).
    concat = jnp.concatenate(head_outs, axis=-1)     # (seq, d_model)

    out = jnp.dot(concat, wo_ref[...], preferred_element_type=jnp.float32) + bo_ref[...]
    o_ref[0] = out.astype(o_ref.dtype)


def multi_head_attention_forward(q, k, v, mask, params, *, n_heads, zero_pad, kq_same):
    """Fused MHA forward. q, k, v: (bs, seq, d_model); mask: (seq, seq)."""
    bs, seq, d_model = q.shape
    assert d_model % n_heads == 0
    d_k = d_model // n_heads

    wk, bk = params["wk"], params["bk"]
    wv, bv = params["wv"], params["bv"]
    wo, bo = params["wo"], params["bo"]
    if kq_same:
        wq, bq = wk, bk
    else:
        wq, bq = params["wq"], params["bq"]

    kernel = functools.partial(_mha_kernel, n_heads=n_heads, d_k=d_k, zero_pad=zero_pad)

    qkv_spec = pl.BlockSpec((1, seq, d_model), lambda b: (b, 0, 0))
    mat_spec = pl.BlockSpec((d_model, d_model), lambda b: (0, 0))
    bias_spec = pl.BlockSpec((1, d_model), lambda b: (0, 0))
    mask_spec = pl.BlockSpec((seq, seq), lambda b: (0, 0))

    out = pl.pallas_call(
        kernel,
        out_shape=jax.ShapeDtypeStruct((bs, seq, d_model), q.dtype),
        grid_spec=pltpu.PrefetchScalarGridSpec(
            num_scalar_prefetch=0,
            grid=(bs,),
            in_specs=[qkv_spec, qkv_spec, qkv_spec, mask_spec,
                      mat_spec, mat_spec, mat_spec, mat_spec,
                      bias_spec, bias_spec, bias_spec, bias_spec],
            out_specs=pl.BlockSpec((1, seq, d_model), lambda b: (b, 0, 0)),
        ),
        compiler_params=pltpu.CompilerParams(
            dimension_semantics=("parallel",),   # batches split across TCs (v7x)
        ),
    )(q, k, v, mask, wq, wk, wv, wo, bq, bk, bv, bo)
    return out


def _mha_reference(q, k, v, mask, params, *, n_heads, zero_pad, kq_same):
    """Plain-JAX reference matching the PyTorch forward (eval-mode dropout)."""
    bs, seq, d_model = q.shape
    d_k = d_model // n_heads
    wk, bk = params["wk"], params["bk"]
    wv, bv = params["wv"], params["bv"]
    wo, bo = params["wo"], params["bo"]
    wq, bq = (wk, bk) if kq_same else (params["wq"], params["bq"])

    hi = jax.lax.Precision.HIGHEST
    qp = jnp.matmul(q, wq, precision=hi) + bq
    kp = jnp.matmul(k, wk, precision=hi) + bk
    vp = jnp.matmul(v, wv, precision=hi) + bv

    def split(x):
        return x.reshape(bs, seq, n_heads, d_k).transpose(0, 2, 1, 3)

    qh, kh, vh = split(qp), split(kp), split(vp)
    s = jnp.einsum("bhqd,bhkd->bhqk", qh, kh, precision=hi) / math.sqrt(d_k)
    s = jnp.where(mask[None, None] == 0, -1e32, s)
    p = jax.nn.softmax(s, axis=-1)
    if zero_pad:
        p = p.at[:, :, 0, :].set(0.0)
    o = jnp.einsum("bhqk,bhkd->bhqd", p, vh, precision=hi)
    concat = o.transpose(0, 2, 1, 3).reshape(bs, seq, d_model)
    return jnp.matmul(concat, wo, precision=hi) + bo


class MultiHeadAttentionJAX:
    """Deterministic synthetic-parameter JAX/Pallas version of the module."""

    def __init__(self, d_model, d_feature, n_heads, dropout, kq_same, bias=True, key=None):
        assert d_feature * n_heads == d_model
        self.d_model = d_model
        self.d_k = d_feature
        self.h = n_heads
        self.kq_same = kq_same
        if key is None:
            key = jax.random.PRNGKey(0)
        kk, kv, kq, ko = jax.random.split(key, 4)
        scale = 1.0 / math.sqrt(d_model)     # xavier-ish deterministic init
        self.params = {
            "wk": scale * jax.random.normal(kk, (d_model, d_model), jnp.float32),
            "wv": scale * jax.random.normal(kv, (d_model, d_model), jnp.float32),
            "wq": scale * jax.random.normal(kq, (d_model, d_model), jnp.float32),
            "wo": scale * jax.random.normal(ko, (d_model, d_model), jnp.float32),
            # torch init sets the projection biases to 0.0
            "bk": jnp.zeros((1, d_model), jnp.float32),
            "bv": jnp.zeros((1, d_model), jnp.float32),
            "bq": jnp.zeros((1, d_model), jnp.float32),
            "bo": jnp.zeros((1, d_model), jnp.float32),
        }

    def __call__(self, q, k, v, mask, zero_pad):
        return multi_head_attention_forward(
            q, k, v, mask, self.params,
            n_heads=self.h, zero_pad=zero_pad, kq_same=self.kq_same)

    def reference(self, q, k, v, mask, zero_pad):
        return _mha_reference(
            q, k, v, mask, self.params,
            n_heads=self.h, zero_pad=zero_pad, kq_same=self.kq_same)


if __name__ == "__main__":
    key = jax.random.PRNGKey(0)
    k_params, k_q, k_k, k_v = jax.random.split(key, 4)

    batch, seq, d_model, n_heads = 2, 8, 32, 4
    d_k = d_model // n_heads

    q = jax.random.normal(k_q, (batch, seq, d_model), dtype=jnp.float32)
    k = jax.random.normal(k_k, (batch, seq, d_model), dtype=jnp.float32)
    v = jax.random.normal(k_v, (batch, seq, d_model), dtype=jnp.float32)
    # causal mask: positions where mask == 0 are filled with -1e32
    mask = jnp.tril(jnp.ones((seq, seq), dtype=jnp.float32))

    module = MultiHeadAttentionJAX(
        d_model=d_model, d_feature=d_k, n_heads=n_heads,
        dropout=0.0, kq_same=False, bias=True, key=k_params)

    out = module(q, k, v, mask, zero_pad=True)
    out = jax.block_until_ready(out)

    ref = module.reference(q, k, v, mask, zero_pad=True)
    assert out.shape == (batch, seq, d_model)
    assert jnp.allclose(out, ref, atol=1e-3, rtol=1e-3), \
        "Pallas MHA output mismatch vs JAX reference"

    print("KERNEL_OK")
</pallas_src>

<mosaic_0001>
module attributes {stable_mosaic.version = 11 : i64} {
  func.func @_mha_kernel(%arg0: i32, %arg1: memref<1x8x32xf32, #tpu.memory_space<vmem>>, %arg2: memref<1x8x32xf32, #tpu.memory_space<vmem>>, %arg3: memref<1x8x32xf32, #tpu.memory_space<vmem>>, %arg4: memref<8x8xf32, #tpu.memory_space<vmem>>, %arg5: memref<32x32xf32, #tpu.memory_space<vmem>>, %arg6: memref<32x32xf32, #tpu.memory_space<vmem>>, %arg7: memref<32x32xf32, #tpu.memory_space<vmem>>, %arg8: memref<32x32xf32, #tpu.memory_space<vmem>>, %arg9: memref<1x32xf32, #tpu.memory_space<vmem>>, %arg10: memref<1x32xf32, #tpu.memory_space<vmem>>, %arg11: memref<1x32xf32, #tpu.memory_space<vmem>>, %arg12: memref<1x32xf32, #tpu.memory_space<vmem>>, %arg13: memref<1x8x32xf32, #tpu.memory_space<vmem>>) attributes {dimension_semantics = [#tpu.dimension_semantics<parallel>], iteration_bounds = array<i64: 2>, scalar_prefetch = 0 : i64, scratch_operands = 0 : i64, tpu.core_type = #tpu.core_type<tc>, window_params = [{transform_indices = @transform_0, window_bounds = array<i64: 1, 8, 32>}, {transform_indices = @transform_1, window_bounds = array<i64: 1, 8, 32>}, {transform_indices = @transform_2, window_bounds = array<i64: 1, 8, 32>}, {pipeline_mode = #tpu.pipeline_mode<synchronous>, transform_indices = @transform_3, window_bounds = array<i64: 8, 8>}, {pipeline_mode = #tpu.pipeline_mode<synchronous>, transform_indices = @transform_4, window_bounds = array<i64: 32, 32>}, {pipeline_mode = #tpu.pipeline_mode<synchronous>, transform_indices = @transform_5, window_bounds = array<i64: 32, 32>}, {pipeline_mode = #tpu.pipeline_mode<synchronous>, transform_indices = @transform_6, window_bounds = array<i64: 32, 32>}, {pipeline_mode = #tpu.pipeline_mode<synchronous>, transform_indices = @transform_7, window_bounds = array<i64: 32, 32>}, {pipeline_mode = #tpu.pipeline_mode<synchronous>, transform_indices = @transform_8, window_bounds = array<i64: 1, 32>}, {pipeline_mode = #tpu.pipeline_mode<synchronous>, transform_indices = @transform_9, window_bounds = array<i64: 1, 32>}, {pipeline_mode = #tpu.pipeline_mode<synchronous>, transform_indices = @transform_10, window_bounds = array<i64: 1, 32>}, {pipeline_mode = #tpu.pipeline_mode<synchronous>, transform_indices = @transform_11, window_bounds = array<i64: 1, 32>}, {transform_indices = @transform_12, window_bounds = array<i64: 1, 8, 32>}]} {
    %c0 = arith.constant 0 : index
    %c0_0 = arith.constant 0 : index
    %c0_1 = arith.constant 0 : index
    %0 = vector.load %arg1[%c0, %c0_0, %c0_1] : memref<1x8x32xf32, #tpu.memory_space<vmem>>, vector<1x8x32xf32>
    %1 = vector.shape_cast %0 : vector<1x8x32xf32> to vector<8x32xf32>
    %c0_2 = arith.constant 0 : index
    %c0_3 = arith.constant 0 : index
    %c0_4 = arith.constant 0 : index
    %2 = vector.load %arg2[%c0_2, %c0_3, %c0_4] : memref<1x8x32xf32, #tpu.memory_space<vmem>>, vector<1x8x32xf32>
    %3 = vector.shape_cast %2 : vector<1x8x32xf32> to vector<8x32xf32>
    %c0_5 = arith.constant 0 : index
    %c0_6 = arith.constant 0 : index
    %c0_7 = arith.constant 0 : index
    %4 = vector.load %arg3[%c0_5, %c0_6, %c0_7] : memref<1x8x32xf32, #tpu.memory_space<vmem>>, vector<1x8x32xf32>
    %5 = vector.shape_cast %4 : vector<1x8x32xf32> to vector<8x32xf32>
    %c0_8 = arith.constant 0 : index
    %c0_9 = arith.constant 0 : index
    %6 = vector.load %arg4[%c0_8, %c0_9] : memref<8x8xf32, #tpu.memory_space<vmem>>, vector<8x8xf32>
    %c0_10 = arith.constant 0 : index
    %c0_11 = arith.constant 0 : index
    %7 = vector.load %arg5[%c0_10, %c0_11] : memref<32x32xf32, #tpu.memory_space<vmem>>, vector<32x32xf32>
    %cst = arith.constant dense<0.000000e+00> : vector<8x32xf32>
    %8 = tpu.matmul %1, %7, %cst {dimension_numbers = #tpu.dot_dimension_numbers<[1], [0], [0], [1], [0, 0, 1, 1], [], []>} : vector<8x32xf32>, vector<32x32xf32>, vector<8x32xf32> -> vector<8x32xf32>
    %c0_12 = arith.constant 0 : index
    %c0_13 = arith.constant 0 : index
    %9 = vector.load %arg9[%c0_12, %c0_13] : memref<1x32xf32, #tpu.memory_space<vmem>>, vector<1x32xf32>
    %10 = vector.broadcast %9 : vector<1x32xf32> to vector<8x32xf32>
    %11 = arith.addf %8, %10 : vector<8x32xf32>
    %c0_14 = arith.constant 0 : index
    %c0_15 = arith.constant 0 : index
    %12 = vector.load %arg6[%c0_14, %c0_15] : memref<32x32xf32, #tpu.memory_space<vmem>>, vector<32x32xf32>
    %cst_16 = arith.constant dense<0.000000e+00> : vector<8x32xf32>
    %13 = tpu.matmul %3, %12, %cst_16 {dimension_numbers = #tpu.dot_dimension_numbers<[1], [0], [0], [1], [0, 0, 1, 1], [], []>} : vector<8x32xf32>, vector<32x32xf32>, vector<8x32xf32> -> vector<8x32xf32>
    %c0_17 = arith.constant 0 : index
    %c0_18 = arith.constant 0 : index
    %14 = vector.load %arg10[%c0_17, %c0_18] : memref<1x32xf32, #tpu.memory_space<vmem>>, vector<1x32xf32>
    %15 = vector.broadcast %14 : vector<1x32xf32> to vector<8x32xf32>
    %16 = arith.addf %13, %15 : vector<8x32xf32>
    %c0_19 = arith.constant 0 : index
    %c0_20 = arith.constant 0 : index
    %17 = vector.load %arg7[%c0_19, %c0_20] : memref<32x32xf32, #tpu.memory_space<vmem>>, vector<32x32xf32>
    %cst_21 = arith.constant dense<0.000000e+00> : vector<8x32xf32>
    %18 = tpu.matmul %5, %17, %cst_21 {dimension_numbers = #tpu.dot_dimension_numbers<[1], [0], [0], [1], [0, 0, 1, 1], [], []>} : vector<8x32xf32>, vector<32x32xf32>, vector<8x32xf32> -> vector<8x32xf32>
    %c0_22 = arith.constant 0 : index
    %c0_23 = arith.constant 0 : index
    %19 = vector.load %arg11[%c0_22, %c0_23] : memref<1x32xf32, #tpu.memory_space<vmem>>, vector<1x32xf32>
    %20 = vector.broadcast %19 : vector<1x32xf32> to vector<8x32xf32>
    %21 = arith.addf %18, %20 : vector<8x32xf32>
    %22 = vector.extract_strided_slice %11 {offsets = [0, 0], sizes = [8, 8], strides = [1, 1]} : vector<8x32xf32> to vector<8x8xf32>
    %23 = vector.extract_strided_slice %16 {offsets = [0, 0], sizes = [8, 8], strides = [1, 1]} : vector<8x32xf32> to vector<8x8xf32>
    %24 = vector.extract_strided_slice %21 {offsets = [0, 0], sizes = [8, 8], strides = [1, 1]} : vector<8x32xf32> to vector<8x8xf32>
    %25 = tpu.transpose %23, [1, 0] : vector<8x8xf32> -> vector<8x8xf32>
    %cst_24 = arith.constant dense<0.000000e+00> : vector<8x8xf32>
    %26 = tpu.matmul %22, %25, %cst_24 {dimension_numbers = #tpu.dot_dimension_numbers<[1], [0], [0], [1], [0, 0, 1, 1], [], []>} : vector<8x8xf32>, vector<8x8xf32>, vector<8x8xf32> -> vector<8x8xf32>
    %cst_25 = arith.constant 0.353553385 : f32
    %27 = vector.broadcast %cst_25 : f32 to vector<8x8xf32>
    %28 = arith.mulf %26, %27 : vector<8x8xf32>
    %cst_26 = arith.constant 0.000000e+00 : f32
    %29 = vector.broadcast %cst_26 : f32 to vector<8x8xf32>
    %30 = arith.cmpf oeq, %6, %29 : vector<8x8xf32>
    %cst_27 = arith.constant -1.000000e+32 : f32
    %31 = vector.broadcast %cst_27 : f32 to vector<8x8xf32>
    %32 = arith.select %30, %31, %28 : vector<8x8xi1>, vector<8x8xf32>
    %cst_28 = arith.constant dense<0xFF800000> : vector<8xf32>
    %33 = vector.multi_reduction <maximumf>, %32, %cst_28 [1] : vector<8x8xf32> to vector<8xf32>
    %34 = vector.shape_cast %33 : vector<8xf32> to vector<8x1xf32>
    %35 = vector.broadcast %34 : vector<8x1xf32> to vector<8x8xf32>
    %36 = arith.subf %32, %35 : vector<8x8xf32>
    %37 = math.exp %36 : vector<8x8xf32>
    %cst_29 = arith.constant dense<0.000000e+00> : vector<8xf32>
    %38 = vector.multi_reduction <add>, %37, %cst_29 [1] : vector<8x8xf32> to vector<8xf32>
    %39 = vector.shape_cast %38 : vector<8xf32> to vector<8x1xf32>
    %40 = vector.broadcast %39 : vector<8x1xf32> to vector<8x8xf32>
    %41 = arith.divf %37, %40 : vector<8x8xf32>
    %42 = tpu.iota {dimensions = array<i32: 0>} : vector<8x8xi32>
    %c0_i32 = arith.constant 0 : i32
    %43 = vector.broadcast %c0_i32 : i32 to vector<8x8xi32>
    %44 = arith.cmpi eq, %42, %43 : vector<8x8xi32>
    %cst_30 = arith.constant 0.000000e+00 : f32
    %45 = vector.broadcast %cst_30 : f32 to vector<8x8xf32>
    %46 = arith.select %44, %45, %41 : vector<8x8xi1>, vector<8x8xf32>
    %cst_31 = arith.constant dense<0.000000e+00> : vector<8x8xf32>
    %47 = tpu.matmul %46, %24, %cst_31 {dimension_numbers = #tpu.dot_dimension_numbers<[1], [0], [0], [1], [0, 0, 1, 1], [], []>} : vector<8x8xf32>, vector<8x8xf32>, vector<8x8xf32> -> vector<8x8xf32>
    %48 = vector.extract_strided_slice %11 {offsets = [0, 8], sizes = [8, 8], strides = [1, 1]} : vector<8x32xf32> to vector<8x8xf32>
    %49 = vector.extract_strided_slice %16 {offsets = [0, 8], sizes = [8, 8], strides = [1, 1]} : vector<8x32xf32> to vector<8x8xf32>
    %50 = vector.extract_strided_slice %21 {offsets = [0, 8], sizes = [8, 8], strides = [1, 1]} : vector<8x32xf32> to vector<8x8xf32>
    %51 = tpu.transpose %49, [1, 0] : vector<8x8xf32> -> vector<8x8xf32>
    %cst_32 = arith.constant dense<0.000000e+00> : vector<8x8xf32>
    %52 = tpu.matmul %48, %51, %cst_32 {dimension_numbers = #tpu.dot_dimension_numbers<[1], [0], [0], [1], [0, 0, 1, 1], [], []>} : vector<8x8xf32>, vector<8x8xf32>, vector<8x8xf32> -> vector<8x8xf32>
    %cst_33 = arith.constant 0.353553385 : f32
    %53 = vector.broadcast %cst_33 : f32 to vector<8x8xf32>
    %54 = arith.mulf %52, %53 : vector<8x8xf32>
    %cst_34 = arith.constant 0.000000e+00 : f32
    %55 = vector.broadcast %cst_34 : f32 to vector<8x8xf32>
    %56 = arith.cmpf oeq, %6, %55 : vector<8x8xf32>
    %cst_35 = arith.constant -1.000000e+32 : f32
    %57 = vector.broadcast %cst_35 : f32 to vector<8x8xf32>
    %58 = arith.select %56, %57, %54 : vector<8x8xi1>, vector<8x8xf32>
    %cst_36 = arith.constant dense<0xFF800000> : vector<8xf32>
    %59 = vector.multi_reduction <maximumf>, %58, %cst_36 [1] : vector<8x8xf32> to vector<8xf32>
    %60 = vector.shape_cast %59 : vector<8xf32> to vector<8x1xf32>
    %61 = vector.broadcast %60 : vector<8x1xf32> to vector<8x8xf32>
    %62 = arith.subf %58, %61 : vector<8x8xf32>
    %63 = math.exp %62 : vector<8x8xf32>
    %cst_37 = arith.constant dense<0.000000e+00> : vector<8xf32>
    %64 = vector.multi_reduction <add>, %63, %cst_37 [1] : vector<8x8xf32> to vector<8xf32>
    %65 = vector.shape_cast %64 : vector<8xf32> to vector<8x1xf32>
    %66 = vector.broadcast %65 : vector<8x1xf32> to vector<8x8xf32>
    %67 = arith.divf %63, %66 : vector<8x8xf32>
    %68 = tpu.iota {dimensions = array<i32: 0>} : vector<8x8xi32>
    %c0_i32_38 = arith.constant 0 : i32
    %69 = vector.broadcast %c0_i32_38 : i32 to vector<8x8xi32>
    %70 = arith.cmpi eq, %68, %69 : vector<8x8xi32>
    %cst_39 = arith.constant 0.000000e+00 : f32
    %71 = vector.broadcast %cst_39 : f32 to vector<8x8xf32>
    %72 = arith.select %70, %71, %67 : vector<8x8xi1>, vector<8x8xf32>
    %cst_40 = arith.constant dense<0.000000e+00> : vector<8x8xf32>
    %73 = tpu.matmul %72, %50, %cst_40 {dimension_numbers = #tpu.dot_dimension_numbers<[1], [0], [0], [1], [0, 0, 1, 1], [], []>} : vector<8x8xf32>, vector<8x8xf32>, vector<8x8xf32> -> vector<8x8xf32>
    %74 = vector.extract_strided_slice %11 {offsets = [0, 16], sizes = [8, 8], strides = [1, 1]} : vector<8x32xf32> to vector<8x8xf32>
    %75 = vector.extract_strided_slice %16 {offsets = [0, 16], sizes = [8, 8], strides = [1, 1]} : vector<8x32xf32> to vector<8x8xf32>
    %76 = vector.extract_strided_slice %21 {offsets = [0, 16], sizes = [8, 8], strides = [1, 1]} : vector<8x32xf32> to vector<8x8xf32>
    %77 = tpu.transpose %75, [1, 0] : vector<8x8xf32> -> vector<8x8xf32>
    %cst_41 = arith.constant dense<0.000000e+00> : vector<8x8xf32>
    %78 = tpu.matmul %74, %77, %cst_41 {dimension_numbers = #tpu.dot_dimension_numbers<[1], [0], [0], [1], [0, 0, 1, 1], [], []>} : vector<8x8xf32>, vector<8x8xf32>, vector<8x8xf32> -> vector<8x8xf32>
    %cst_42 = arith.constant 0.353553385 : f32
    %79 = vector.broadcast %cst_42 : f32 to vector<8x8xf32>
    %80 = arith.mulf %78, %79 : vector<8x8xf32>
    %cst_43 = arith.constant 0.000000e+00 : f32
    %81 = vector.broadcast %cst_43 : f32 to vector<8x8xf32>
    %82 = arith.cmpf oeq, %6, %81 : vector<8x8xf32>
    %cst_44 = arith.constant -1.000000e+32 : f32
    %83 = vector.broadcast %cst_44 : f32 to vector<8x8xf32>
    %84 = arith.select %82, %83, %80 : vector<8x8xi1>, vector<8x8xf32>
    %cst_45 = arith.constant dense<0xFF800000> : vector<8xf32>
    %85 = vector.multi_reduction <maximumf>, %84, %cst_45 [1] : vector<8x8xf32> to vector<8xf32>
    %86 = vector.shape_cast %85 : vector<8xf32> to vector<8x1xf32>
    %87 = vector.broadcast %86 : vector<8x1xf32> to vector<8x8xf32>
    %88 = arith.subf %84, %87 : vector<8x8xf32>
    %89 = math.exp %88 : vector<8x8xf32>
    %cst_46 = arith.constant dense<0.000000e+00> : vector<8xf32>
    %90 = vector.multi_reduction <add>, %89, %cst_46 [1] : vector<8x8xf32> to vector<8xf32>
    %91 = vector.shape_cast %90 : vector<8xf32> to vector<8x1xf32>
    %92 = vector.broadcast %91 : vector<8x1xf32> to vector<8x8xf32>
    %93 = arith.divf %89, %92 : vector<8x8xf32>
    %94 = tpu.iota {dimensions = array<i32: 0>} : vector<8x8xi32>
    %c0_i32_47 = arith.constant 0 : i32
    %95 = vector.broadcast %c0_i32_47 : i32 to vector<8x8xi32>
    %96 = arith.cmpi eq, %94, %95 : vector<8x8xi32>
    %cst_48 = arith.constant 0.000000e+00 : f32
    %97 = vector.broadcast %cst_48 : f32 to vector<8x8xf32>
    %98 = arith.select %96, %97, %93 : vector<8x8xi1>, vector<8x8xf32>
    %cst_49 = arith.constant dense<0.000000e+00> : vector<8x8xf32>
    %99 = tpu.matmul %98, %76, %cst_49 {dimension_numbers = #tpu.dot_dimension_numbers<[1], [0], [0], [1], [0, 0, 1, 1], [], []>} : vector<8x8xf32>, vector<8x8xf32>, vector<8x8xf32> -> vector<8x8xf32>
    %100 = vector.extract_strided_slice %11 {offsets = [0, 24], sizes = [8, 8], strides = [1, 1]} : vector<8x32xf32> to vector<8x8xf32>
    %101 = vector.extract_strided_slice %16 {offsets = [0, 24], sizes = [8, 8], strides = [1, 1]} : vector<8x32xf32> to vector<8x8xf32>
    %102 = vector.extract_strided_slice %21 {offsets = [0, 24], sizes = [8, 8], strides = [1, 1]} : vector<8x32xf32> to vector<8x8xf32>
    %103 = tpu.transpose %101, [1, 0] : vector<8x8xf32> -> vector<8x8xf32>
    %cst_50 = arith.constant dense<0.000000e+00> : vector<8x8xf32>
    %104 = tpu.matmul %100, %103, %cst_50 {dimension_numbers = #tpu.dot_dimension_numbers<[1], [0], [0], [1], [0, 0, 1, 1], [], []>} : vector<8x8xf32>, vector<8x8xf32>, vector<8x8xf32> -> vector<8x8xf32>
    %cst_51 = arith.constant 0.353553385 : f32
    %105 = vector.broadcast %cst_51 : f32 to vector<8x8xf32>
    %106 = arith.mulf %104, %105 : vector<8x8xf32>
    %cst_52 = arith.constant 0.000000e+00 : f32
    %107 = vector.broadcast %cst_52 : f32 to vector<8x8xf32>
    %108 = arith.cmpf oeq, %6, %107 : vector<8x8xf32>
    %cst_53 = arith.constant -1.000000e+32 : f32
    %109 = vector.broadcast %cst_53 : f32 to vector<8x8xf32>
    %110 = arith.select %108, %109, %106 : vector<8x8xi1>, vector<8x8xf32>
    %cst_54 = arith.constant dense<0xFF800000> : vector<8xf32>
    %111 = vector.multi_reduction <maximumf>, %110, %cst_54 [1] : vector<8x8xf32> to vector<8xf32>
    %112 = vector.shape_cast %111 : vector<8xf32> to vector<8x1xf32>
    %113 = vector.broadcast %112 : vector<8x1xf32> to vector<8x8xf32>
    %114 = arith.subf %110, %113 : vector<8x8xf32>
    %115 = math.exp %114 : vector<8x8xf32>
    %cst_55 = arith.constant dense<0.000000e+00> : vector<8xf32>
    %116 = vector.multi_reduction <add>, %115, %cst_55 [1] : vector<8x8xf32> to vector<8xf32>
    %117 = vector.shape_cast %116 : vector<8xf32> to vector<8x1xf32>
    %118 = vector.broadcast %117 : vector<8x1xf32> to vector<8x8xf32>
    %119 = arith.divf %115, %118 : vector<8x8xf32>
    %120 = tpu.iota {dimensions = array<i32: 0>} : vector<8x8xi32>
    %c0_i32_56 = arith.constant 0 : i32
    %121 = vector.broadcast %c0_i32_56 : i32 to vector<8x8xi32>
    %122 = arith.cmpi eq, %120, %121 : vector<8x8xi32>
    %cst_57 = arith.constant 0.000000e+00 : f32
    %123 = vector.broadcast %cst_57 : f32 to vector<8x8xf32>
    %124 = arith.select %122, %123, %119 : vector<8x8xi1>, vector<8x8xf32>
    %cst_58 = arith.constant dense<0.000000e+00> : vector<8x8xf32>
    %125 = tpu.matmul %124, %102, %cst_58 {dimension_numbers = #tpu.dot_dimension_numbers<[1], [0], [0], [1], [0, 0, 1, 1], [], []>} : vector<8x8xf32>, vector<8x8xf32>, vector<8x8xf32> -> vector<8x8xf32>
    %126 = tpu.concatenate %47, %73, %99, %125 in 1 : vector<8x8xf32>, vector<8x8xf32>, vector<8x8xf32>, vector<8x8xf32> -> vector<8x32xf32>
    %c0_59 = arith.constant 0 : index
    %c0_60 = arith.constant 0 : index
    %127 = vector.load %arg8[%c0_59, %c0_60] : memref<32x32xf32, #tpu.memory_space<vmem>>, vector<32x32xf32>
    %cst_61 = arith.constant dense<0.000000e+00> : vector<8x32xf32>
    %128 = tpu.matmul %126, %127, %cst_61 {dimension_numbers = #tpu.dot_dimension_numbers<[1], [0], [0], [1], [0, 0, 1, 1], [], []>} : vector<8x32xf32>, vector<32x32xf32>, vector<8x32xf32> -> vector<8x32xf32>
    %c0_62 = arith.constant 0 : index
    %c0_63 = arith.constant 0 : index
    %129 = vector.load %arg12[%c0_62, %c0_63] : memref<1x32xf32, #tpu.memory_space<vmem>>, vector<1x32xf32>
    %130 = vector.broadcast %129 : vector<1x32xf32> to vector<8x32xf32>
    %131 = arith.addf %128, %130 : vector<8x32xf32>
    %c0_64 = arith.constant 0 : index
    %c0_65 = arith.constant 0 : index
    %c0_66 = arith.constant 0 : index
    %132 = vector.load %arg13[%c0_64, %c0_65, %c0_66] : memref<1x8x32xf32, #tpu.memory_space<vmem>>, vector<1x8x32xf32>
    %133 = vector.shape_cast %132 : vector<1x8x32xf32> to vector<8x32xf32>
    %134 = vector.shape_cast %131 : vector<8x32xf32> to vector<1x8x32xf32>
    tpu.vector_store %arg13[%c0_64, %c0_65, %c0_66], %134 {strides = array<i32>} : memref<1x8x32xf32, #tpu.memory_space<vmem>>, vector<1x8x32xf32>,
    return
  }
  func.func @transform_0(%arg0: i32) -> (i32, i32, i32) {
    %c0_i32 = arith.constant 0 : i32
    %c0_i32_0 = arith.constant 0 : i32
    %c0_i32_1 = arith.constant 0 : i32
    return %arg0, %c0_i32, %c0_i32_0 : i32, i32, i32
  }
  func.func @transform_1(%arg0: i32) -> (i32, i32, i32) {
    %c0_i32 = arith.constant 0 : i32
    %c0_i32_0 = arith.constant 0 : i32
    %c0_i32_1 = arith.constant 0 : i32
    return %arg0, %c0_i32, %c0_i32_0 : i32, i32, i32
  }
  func.func @transform_2(%arg0: i32) -> (i32, i32, i32) {
    %c0_i32 = arith.constant 0 : i32
    %c0_i32_0 = arith.constant 0 : i32
    %c0_i32_1 = arith.constant 0 : i32
    return %arg0, %c0_i32, %c0_i32_0 : i32, i32, i32
  }
  func.func @transform_3(%arg0: i32) -> (i32, i32) {
    %c0_i32 = arith.constant 0 : i32
    %c0_i32_0 = arith.constant 0 : i32
    %c0_i32_1 = arith.constant 0 : i32
    return %c0_i32, %c0_i32_0 : i32, i32
  }
  func.func @transform_4(%arg0: i32) -> (i32, i32) {
    %c0_i32 = arith.constant 0 : i32
    %c0_i32_0 = arith.constant 0 : i32
    %c0_i32_1 = arith.constant 0 : i32
    return %c0_i32, %c0_i32_0 : i32, i32
  }
  func.func @transform_5(%arg0: i32) -> (i32, i32) {
    %c0_i32 = arith.constant 0 : i32
    %c0_i32_0 = arith.constant 0 : i32
    %c0_i32_1 = arith.constant 0 : i32
    return %c0_i32, %c0_i32_0 : i32, i32
  }
  func.func @transform_6(%arg0: i32) -> (i32, i32) {
    %c0_i32 = arith.constant 0 : i32
    %c0_i32_0 = arith.constant 0 : i32
    %c0_i32_1 = arith.constant 0 : i32
    return %c0_i32, %c0_i32_0 : i32, i32
  }
  func.func @transform_7(%arg0: i32) -> (i32, i32) {
    %c0_i32 = arith.constant 0 : i32
    %c0_i32_0 = arith.constant 0 : i32
    %c0_i32_1 = arith.constant 0 : i32
    return %c0_i32, %c0_i32_0 : i32, i32
  }
  func.func @transform_8(%arg0: i32) -> (i32, i32) {
    %c0_i32 = arith.constant 0 : i32
    %c0_i32_0 = arith.constant 0 : i32
    %c0_i32_1 = arith.constant 0 : i32
    return %c0_i32, %c0_i32_0 : i32, i32
  }
  func.func @transform_9(%arg0: i32) -> (i32, i32) {
    %c0_i32 = arith.constant 0 : i32
    %c0_i32_0 = arith.constant 0 : i32
    %c0_i32_1 = arith.constant 0 : i32
    return %c0_i32, %c0_i32_0 : i32, i32
  }
  func.func @transform_10(%arg0: i32) -> (i32, i32) {
    %c0_i32 = arith.constant 0 : i32
    %c0_i32_0 = arith.constant 0 : i32
    %c0_i32_1 = arith.constant 0 : i32
    return %c0_i32, %c0_i32_0 : i32, i32
  }
  func.func @transform_11(%arg0: i32) -> (i32, i32) {
    %c0_i32 = arith.constant 0 : i32
    %c0_i32_0 = arith.constant 0 : i32
    %c0_i32_1 = arith.constant 0 : i32
    return %c0_i32, %c0_i32_0 : i32, i32
  }
  func.func @transform_12(%arg0: i32) -> (i32, i32, i32) {
    %c0_i32 = arith.constant 0 : i32
    %c0_i32_0 = arith.constant 0 : i32
    %c0_i32_1 = arith.constant 0 : i32
    return %arg0, %c0_i32, %c0_i32_0 : i32, i32, i32
  }
}

</mosaic_0001>

<bundles_post_ra>
// kernel: tpu_custom_call.1
= control target key start
LH: loop header
LB: loop body
LE: loop exit
PB: predicated region body
PF: predicated region fallthrough
CT: control target
= control target key end

     0   :  { %s2144_s0 = inlined_call_operand.hbm [shape: f32[2,8,32], index: 0, kind: input, shape index: {}]   ;;  %s2145_s1 = inlined_call_operand.hbm [shape: f32[2,8,32], index: 1, kind: input, shape index: {}]   ;;  %s2146_s2 = inlined_call_operand.hbm [shape: f32[2,8,32], index: 2, kind: input, shape index: {}]   ;;  %s2147_s3 = inlined_call_operand.hbm [shape: f32[8,8], index: 3, kind: input, shape index: {}]   ;;  %s2148_s4 = inlined_call_operand.hbm [shape: f32[32,32], index: 4, kind: input, shape index: {}]   ;;  %s2149_s5 = inlined_call_operand.hbm [shape: f32[32,32], index: 5, kind: input, shape index: {}]   ;;  %s2150_s6 = inlined_call_operand.hbm [shape: f32[32,32], index: 6, kind: input, shape index: {}]   ;;  %s2151_s7 = inlined_call_operand.hbm [shape: f32[32,32], index: 7, kind: input, shape index: {}]   ;;  %s2152_s8 = inlined_call_operand.vmem [shape: f32[1,32], index: 8, kind: input, shape index: {}]   ;;  %s2153_s9 = inlined_call_operand.vmem [shape: f32[1,32], index: 9, kind: input, shape index: {}]   ;;  %s2154_s10 = inlined_call_operand.vmem [shape: f32[1,32], index: 10, kind: input, shape index: {}]   ;;  %s2155_s11 = inlined_call_operand.vmem [shape: f32[1,32], index: 11, kind: input, shape index: {}]   ;;  %s2156_s12 = inlined_call_operand.hbm [shape: f32[2,8,32], index: 12, kind: output, shape index: {}]  }
   0x1   :  { %2171 = sst [smem:[#allocation29_spill]] %s2145_s1 }
   0x2   :  { %2172 = sst [smem:[#allocation30_spill]] %s2147_s3 }
   0x3   :  { %2173 = sst [smem:[#allocation31_spill]] %s2148_s4 }
   0x4   :  { %2174 = sst [smem:[#allocation32_spill]] %s2149_s5 }
   0x5   :  { %2175 = sst [smem:[#allocation33_spill]] %s2155_s11 }
   0x6   :  { %2176 = sst [smem:[#allocation34_spill]] %s2156_s12 }
   0x7   :  { %17 = vsyncpa [#allocation3], 0 }
   0x8   :  { %19 = vsyncpa [#allocation3 + $0x1], 0 }
   0x9   :  { %20 = vsyncpa [#allocation6], 0 }
   0xa   :  { %22 = vsyncpa [#allocation6 + $0x1], 0 }
   0xb   :  { %23 = vsyncpa [#allocation9], 0 }
   0xc   :  { %24 = vsyncpa [#allocation12], 0 }
   0xd   :  { %25 = vsyncpa [#allocation15], 0 }
   0xe   :  { %26 = vsyncpa [#allocation4], 0 }
   0xf   :  { %28 = vsyncpa [#allocation4 + $0x1], 0  ;;  %s1817_s21 = smov 0   ;;  %s1819_s22 = smov 0  }
  0x10   :  { %s1821_s23 = smov 0   ;;  %s1823_s24 = smov 0  }
  0x11 LB: > { %2177 = sst [smem:[#allocation23_spill]] %s1725_s21  ;;  %s1841_s28 = sadd.s32 4294967295, %s1737_s24   ;;  %s1737_s24 = sphi %s1823_s24, %s2209_s24   ;;  %s1733_s23 = sphi %s1821_s23, %s2213_s23   ;;  %s1729_s22 = sphi %s1819_s22, %s2212_s22   ;;  %s1725_s21 = sphi %s1817_s21, %s2211_s21  }
  0x12   : > { %2178 = sst [smem:[#allocation24_spill]] %s1737_s24  ;;  %p1237_p0 = scmp.ge.s32.totalorder %s1737_s24, 1 }
  0x13   : > { %s2179_s3 = sld [smem:[#allocation30_spill]]  ;;  %p2167_p1 = scmp.eq.s32.totalorder %s1841_s28, 0 }
  0x14   : > { %p332_p2 = scmp.lt.s32.totalorder %s1737_s24, 3  ;;  %s1739_s30 = smov [#allocation8]  }
  0x15   : > { %s346_s13 = sshll.u32 %s1739_s30, 4  ;;  %s2181_s5 = sld [smem:[#allocation32_spill]]  ;;  %s347_s13 = int_to_ptr.vmem [resolvable:$true] %s346_s13 }
  0x16   : > { %p1846_p3 = pnand %p1237_p0, %p332_p2  ;;  %s1740_s18 = smov [#allocation11]  }
  0x17   : > { %s371_s19 = sshll.u32 %s1740_s18, 4  ;;  %s2157_s20 = smov 128   ;;  %s372_s19 = int_to_ptr.vmem [resolvable:$true] %s371_s19 }
  0x18   : > { %p1308_p5 = pneg %p1846_p3  ;;  %s2159_s25 = smov 8  }
  0x19   : > { %s344_s27 = sshll.u32 %s2179_s3, 4  ;;  %s1236_s26 = sadd.s32 4294967294, %s1737_s24   ;;  %s345_s27 = int_to_ptr.hbm [resolvable:$true] %s344_s27 }
  0x1a   : > { %p1858_p6 = pnand %p1308_p5, %p2167_p1  ;;  %s1871_s30 = sadd.s32 1, %s1737_s24  }
  0x1b   : > { %s369_s16 = sshll.u32 %s2181_s5, 4  ;;  %2183 = sst [smem:[#allocation25_spill]] %s1871_s30  ;;  %s370_s16 = int_to_ptr.hbm [resolvable:$true] %s369_s16 }
  0x1c   : > { %1311 = dma.hbm_to_vmem [thread:$0]  (!%p1858_p6), %s345_s27, 128, %s347_s13, [#allocation9]  }
  0x1d   : > { %1317 = dma.hbm_to_vmem [thread:$0]  (!%p1858_p6), %s370_s16, 512, %s372_s19, [#allocation12], %s2157_s20, %s2157_s20, %s2159_s25  }
  0x1e   : > { %s38_s14 = ssub.s32 %s1737_s24, %s1871_s30  ;;  %s41_s15 = sadd.s32 1, %s1733_s23 }
  0x1f   : > { %p39_p7 = scmp.eq.s32.totalorder %s38_s14, 0  ;;  %p48_p8 = scmp.ne.s32.totalorder %s1733_s23, %s1729_s22 }
  0x20   : > { %p49_p9 = scmp.eq.s32.totalorder %s1737_s24, 0  ;;  %p54_p10 = scmp.ne.s32.totalorder %s1729_s22, %s1725_s21 }
  0x21   : > { %s1882_s27 = scalar_select %p39_p7, %s1733_s23, %s41_s15  }
  0x22   : > { %p50_p11 = por %p49_p9, %p48_p8  ;;  %p1886_p12 = por %p2167_p1, %p54_p10 }
  0x23   : > { %2184 = sst [smem:[#allocation26_spill]] %s1882_s27  ;;  %p319_p13 = scmp.eq.s32.totalorder %s1841_s28, 1 }
  0x24   : > { %p325_p0 = scmp.eq.s32.totalorder %s1236_s26, 1  ;;  %p1343_p2 = scmp.lt.s32.totalorder %s1737_s24, 2 }
  0x25   : > { %s2164_s16 = sand.u32 1, %s1733_s23   ;;  %p1893_p5 = por %p319_p13, %p48_p8 }
  0x26   : > { %p1897_p4 = por %p325_p0, %p54_p10  ;;  %s1903_s14 = sshll.u32 %s2164_s16, 3 }
  0x27   : > { %s2186_s18 = scalar_select %p1893_p5, 1, 0 }
  0x28   : > { %s2188_s19 = scalar_select %p1897_p4, 1, 0 }
  0x29   : > { %2187 = sst [smem:[#allocation27_spill]] %s2186_s18  ;;  %s1906_s15 = sshll.u32 %s1737_s24, 3 }
  0x2a   : > { %2189 = sst [smem:[#allocation28_spill]] %s2188_s19  ;;  %p1908_p7 = pnand %p1343_p2, %p50_p11 }
  0x2b   : > { %s444_s26 = sand.u32 1, %s1737_s24   ;;  %s2191_s1 = sld [smem:[#allocation29_spill]] }
  0x2c   : > { %s448_s30 = scalar_lea.vmem [#allocation5], %s1903_s14  ;;  %s1918_s16 = scalar_lea.sflag [#allocation6], %s444_s26 }
  0x2d   : > { %s456_s19 = sshll.u32 %s448_s30, 4  ;;  %p1479_p9 = pneg %p1908_p7  ;;  %s457_s19 = int_to_ptr.vmem [resolvable:$true] %s456_s19 }
  0x31   : > { %s452_s5 = scalar_lea.hbm %s2191_s1, %s1906_s15 }
  0x32   : > { %s454_s27 = sshll.u32 %s452_s5, 4  ;;  %s1482_s5 = scalar_lea.hbm %s2191_s1, 16  ;;  %s455_s27 = int_to_ptr.hbm [resolvable:$true] %s454_s27 }
  0x33   : > { %s1475_s21 = sshra.s32 %s455_s27, 4  ;;  %s1476_s21 = int_to_ptr.hbm [resolvable:$true] %s1475_s21 }
  0x34   : > { %s1477_s11 = scalar_lea.hbm %s1476_s21, 8  ;;  %p1483_p13 = scmp.lt.s32.totalorder %s1476_s21, %s2191_s1 }
  0x35   : > { %p1478_p8 = scmp.ne.s32.totalorder %s1476_s21, %s1477_s11  ;;  %p1484_p0 = scmp.lt.s32.totalorder %s1482_s5, %s1477_s11 }
  0x37   : > { %p1480_p10 = pnand %p1479_p9, %p1478_p8  ;;  %p1485_p2 = por %p1484_p0, %p1483_p13 }
  0x39   : > { %p1481_p11 = pneg %p1480_p10 }
  0x3b   : > { %p1486_p1 = pnand %p1485_p2, %p1481_p11 }
  0x3d   : > { %1489 = shalt.err (!%p1486_p1)
}
  0x3e   : > { %1330 = dma.hbm_to_vmem [thread:$0]  (!%p1908_p7), %s455_s27, 128, %s457_s19, %s1918_s16  }
  0x3f   : > { %s2192_s4 = sld [smem:[#allocation31_spill]]  ;;  %s1743_s24 = smov [#allocation10]  }
  0x40   : > { %s357_s3 = sshll.u32 %s1743_s24, 4  ;;  %s383_s5 = sshll.u32 %s2150_s6, 4  ;;  %s358_s3 = int_to_ptr.vmem [resolvable:$true] %s357_s3  ;;  %s384_s5 = int_to_ptr.hbm [resolvable:$true] %s383_s5 }
  0x41   : > { %s2193_s25 = smov 8   ;;  %s2194_s30 = smov 128  }
  0x42   : > { %s1744_s27 = smov [#allocation13]   ;;  %s397_s1 = sshll.u32 %s2151_s7, 4  ;;  %s398_s1 = int_to_ptr.hbm [resolvable:$true] %s397_s1 }
  0x43   : > { %s385_s18 = sshll.u32 %s1744_s27, 4  ;;  %s1745_s24 = smov [#allocation14]   ;;  %s386_s18 = int_to_ptr.vmem [resolvable:$true] %s385_s18 }
  0x44   : > { %1320 = dma.hbm_to_vmem [thread:$0]  (!%p1858_p6), %s384_s5, 512, %s386_s18, [#allocation12], %s2194_s30, %s2194_s30, %s2193_s25  }
  0x45   : > { %s355_s12 = sshll.u32 %s2192_s4, 4  ;;  %s399_s11 = sshll.u32 %s1745_s24, 4  ;;  %s356_s12 = int_to_ptr.hbm [resolvable:$true] %s355_s12  ;;  %s400_s11 = int_to_ptr.vmem [resolvable:$true] %s399_s11 }
  0x46   : > { %1314 = dma.hbm_to_vmem [thread:$0]  (!%p1858_p6), %s356_s12, 512, %s358_s3, [#allocation9], %s2194_s30, %s2194_s30, %s2193_s25  }
  0x47   : > { %s433_s21 = scalar_lea.hbm %s2144_s0, %s1906_s15  ;;  %s429_s19 = scalar_lea.vmem [#allocation2], %s1903_s14 }
  0x48   : > { %1323 = dma.hbm_to_vmem [thread:$0]  (!%p1858_p6), %s398_s1, 512, %s400_s11, [#allocation15], %s2194_s30, %s2194_s30, %s2193_s25  }
  0x49   : > { %s435_s27 = sshll.u32 %s433_s21, 4  ;;  %s437_s26 = sshll.u32 %s429_s19, 4  ;;  %s436_s27 = int_to_ptr.hbm [resolvable:$true] %s435_s27  ;;  %s438_s26 = int_to_ptr.vmem [resolvable:$true] %s437_s26 }
  0x4a   : > { %s2195_s4 = sand.u32 1, %s1733_s23   ;;  %s1595_s18 = sshra.s32 %s436_s27, 4  ;;  %s1596_s18 = int_to_ptr.hbm [resolvable:$true] %s1595_s18 }
  0x4b   : > { %s426_s5 = scalar_lea.sflag [#allocation3], %s2195_s4  ;;  %s1597_s24 = scalar_lea.hbm %s1596_s18, 8 }
  0x4c   : > { %p1598_p1 = scmp.ne.s32.totalorder %s1596_s18, %s1597_s24  ;;  %s1602_s3 = scalar_lea.hbm %s2144_s0, 16 }
  0x4d   : > { %p1603_p6 = scmp.lt.s32.totalorder %s1596_s18, %s2144_s0  ;;  %p1604_p11 = scmp.lt.s32.totalorder %s1602_s3, %s1597_s24 }
  0x4e   : > { %p1600_p8 = pnand %p1598_p1, %p1479_p9 }
  0x4f   : > { %p1605_p13 = por %p1604_p11, %p1603_p6 }
  0x50   : > { %p1601_p10 = pneg %p1600_p8 }
  0x52   : > { %p1606_p0 = pnand %p1605_p13, %p1601_p10 }
  0x54   : > { %1609 = shalt.err (!%p1606_p0)
}
  0x55   : > { %1327 = dma.hbm_to_vmem [thread:$0]  (!%p1908_p7), %s436_s27, 128, %s438_s26, %s426_s5  }
  0x56   : > { %s471_s11 = scalar_lea.hbm %s2146_s2, %s1906_s15  ;;  %s467_s19 = scalar_lea.vmem [#allocation7], %s1903_s14 }
  0x57   : > { %s473_s21 = sshll.u32 %s471_s11, 4  ;;  %s475_s17 = sshll.u32 %s467_s19, 4  ;;  %s474_s21 = int_to_ptr.hbm [resolvable:$true] %s473_s21  ;;  %s476_s17 = int_to_ptr.vmem [resolvable:$true] %s475_s17 }
  0x58   : > { %s1625_s18 = sshra.s32 %s474_s21, 4  ;;  %s1632_s27 = scalar_lea.hbm %s2146_s2, 16  ;;  %s1626_s18 = int_to_ptr.hbm [resolvable:$true] %s1625_s18 }
  0x59   : > { %s1627_s24 = scalar_lea.hbm %s1626_s18, 8  ;;  %p1633_p10 = scmp.lt.s32.totalorder %s1626_s18, %s2146_s2 }
  0x5a   : > { %p1628_p2 = scmp.ne.s32.totalorder %s1626_s18, %s1627_s24  ;;  %p1634_p6 = scmp.lt.s32.totalorder %s1632_s27, %s1627_s24 }
  0x5c   : > { %p1630_p1 = pnand %p1628_p2, %p1479_p9  ;;  %p1635_p11 = por %p1634_p6, %p1633_p10 }
  0x5e   : > { %p1631_p8 = pneg %p1630_p1 }
  0x60   : > { %p1636_p13 = pnand %p1635_p11, %p1631_p8 }
  0x62   : > { %1639 = shalt.err (!%p1636_p13)
}
  0x63   : > { %1333 = dma.hbm_to_vmem [thread:$0]  (!%p1908_p7), %s474_s21, 128, %s476_s17, %s1918_s16  }
  0x64   : > { %484 = sbr.rel (%p1846_p3) target bundleno = 1165 (0x48d), region = 68  ;;  %s1996_s14 = sand.u32 (!%p1846_p3), 1, %s1729_s22  }
  0x65   : > { %s1999_s15 = sshll.u32 (!%p1846_p3), %s1996_s14, 3  ;;  %s487_s1 = scalar_lea.sflag (!%p1846_p3), [#allocation3], %s1996_s14 }
  0x66   : > { %s490_s25 = scalar_lea.vmem (!%p1846_p3), [#allocation2], %s1999_s15 }
  0x69   : > { %1700 = dma.done.wait (%p1886_p12), %s487_s1, 128  }
  0x6a   : > { %1702 = vsyncadd (%p1886_p12), %s487_s1, 4294967168  ;;  %s496_s29 = sand.u32 1, %s1841_s28   ;;  %s500_s16 = scalar_lea.vmem [#allocation5], %s1999_s15 }
  0x6b   : > { %s497_s20 = scalar_lea.sflag [#allocation6], %s496_s29 }
  0x6c   : > { %1704 = dma.done.wait (%p1886_p12), %s497_s20, 256  }
  0x6d   : > { %1706 = vsyncadd (%p1886_p12), %s497_s20, 4294967040  ;;  %s510_s4 = scalar_lea.vmem [#allocation7], %s1999_s15  ;;  %p2196_p3 = scmp.eq.s32.totalorder %s1841_s28, 0 }
  0x6f   : > { %1708 = dma.done.wait (%p2196_p3), [#allocation9], 640   ;;  %p2197_p7 = pmov %p2196_p3 }
  0x70   : > { %p2198_p9 = pmov %p2196_p3 }
  0x71   : > { %1710 = vsyncadd (%p2197_p7), [#allocation9], 4294966656 }
  0x72   : > { %1712 = dma.done.wait (%p2198_p9), [#allocation12], 1024   ;;  %p2199_p0 = pmov %p2196_p3 }
  0x74   : > { %1714 = vsyncadd (%p2199_p0), [#allocation12], 4294966272  ;;  %p2200_p2 = pmov %p2199_p0 }
  0x75   : > { %p2201_p1 = pmov %p2199_p0 }
  0x76   : > { %1716 = dma.done.wait (%p2200_p2), [#allocation15], 512  }
  0x77   : > { %1718 = vsyncadd (%p2201_p1), [#allocation15], 4294966784  ;;  %v626_v0 = vld [vmem:[#allocation11 + $0x18] sm:$0xff]  ;;  %v625_v1 = vld [vmem:[#allocation11 + $0x10] sm:$0xff]  ;;  %vm599_vm0 = vcmask 261120   ;;  %vm685_vm1 = vcmask 64512  }
  0x78   : > { %v594_v2 = vld [vmem:[#allocation10 + $0x18] sm:$0xff]  ;;  %646 = vmatpush.msra.mxu1 %v626_v0  ;;  %v593_v3 = vld [vmem:[#allocation10 + $0x10] sm:$0xff]  ;;  %v624_v4 = vld [vmem:[#allocation11 + $0x8] sm:$0xff]  ;;  %s1746_s19 = smov 104   ;;  %s1747_s17 = smov 120  }
  0x79   : > { %615 = vmatpush.msra.mxu0 %v594_v2  ;;  %v592_v5 = vld [vmem:[#allocation10 + $0x8] sm:$0xff]  ;;  %v623_v6 = vld [vmem:[#allocation11] sm:$0xff]  ;;  %s1748_s18 = smov 112   ;;  %v657_v16 = vld [vmem:[#allocation13 + $0x18] sm:$0xff]  ;;  %s1749_s3 = smov 8  }
  0x7a   : > { %647 = vmatpush.msra.mxu1 %v625_v1  ;;  %v591_v7 = vld [vmem:[#allocation10] sm:$0xff]  ;;  %v587_v9 = vld [vmem:[%s490_s25] sm:$0xff]  ;;  %677 = vmatpush.msra.mxu2 %v657_v16  ;;  %v590_v27 = vld [vmem:[#allocation8] sm:$0xff]  ;;  %s1750_s27 = smov 16   ;;  %s1751_s26 = smov 24  }
  0x7b   : > { %616 = vmatpush.msra.mxu0 %v593_v3  ;;  %v588_v8 = vld [vmem:[%s500_s16] sm:$0xff]  ;;  %v1395_v10 = vld [vmem:[%s2153_s9] ss:$0 sm:$0xff]  ;;  %v656_v17 = vld [vmem:[#allocation13 + $0x10] sm:$0xff]  ;;  %vm713_vm2 = vcmp.eq.f32.partialorder %v590_v27, 0.0  ;;  %s1277_s5 = sshll.u32 %s1841_s28, 3 }
  0x7c   : > { %648 = vmatpush.msra.mxu1 %v624_v4  ;;  %v1396_v11 = vld [vmem:[%s2152_s8] ss:$0 sm:$0xff]  ;;  %678 = vmatpush.msra.mxu2 %v656_v17  ;;  %v654_v19 = vld [vmem:[#allocation13] sm:$0xff]  ;;  %v739_v4 = vlaneseq  ;;  %s2202_s29 = sld [smem:[#allocation34_spill]]  ;;  %s586_s11 = scalar_lea.vmem [#allocation16], %s1999_s15 }
  0x7d   : > { %617 = vmatpush.msra.mxu0 %v592_v5  ;;  %v655_v18 = vld [vmem:[#allocation13 + $0x8] sm:$0xff]  ;;  %s2204_s30 = sld [smem:[#allocation33_spill]]  ;;  %s1072_s21 = sshll.u32 %s586_s11, 4  ;;  %s1073_s21 = int_to_ptr.vmem [resolvable:$true] %s1072_s21 }
  0x7e   : > { %649 = vmatpush.msra.mxu1 %v623_v6  ;;  %679 = vmatpush.msra.mxu2 %v655_v18  ;;  %v589_v20 = vld [vmem:[%s510_s4] sm:$0xff] }
  0x7f   : > { %618 = vmatpush.msra.mxu0 %v591_v7  ;;  %1261 = vmatmul.msk.f32.vlgmr.msra.gmra.mxu1 %vm599_vm0, %v588_v8  ;;  %v1397_v32 = vld [vmem:[%s2154_s10] ss:$0 sm:$0xff] }
  0x80   : > { %1260 = vmatmul.msk.f32.vlgmr.msra.gmra.mxu0 %vm599_vm0, %v587_v9  ;;  %680 = vmatpush.msra.mxu2 %v654_v19 }
  0x81   : > { %1262 = vmatmul.msk.f32.vlgmr.msra.gmra.mxu2 %vm599_vm0, %v589_v20 }
  0x82   : > { %s1070_s16 = scalar_lea.hbm %s2202_s29, %s1277_s5  ;;  %s1675_s15 = scalar_lea.hbm %s2202_s29, 16 }
  0xfc   : > { %v651_v12 = vpop.f32.mrf.mxu1 }
  0xfd   : > { %v620_v13 = vpop.f32.mrf.mxu0  ;;  %v652_v14 = vadd.f32 %v1395_v10, %v651_v12 }
  0xfe   : > { %v621_v15 = vadd.f32 %v1396_v11, %v620_v13  ;;  %v2080_v11 = vshrl.u32 %v739_v4, 7 }
  0xff   : > { %931 = vrot.lane.b32.xlu2 %v652_v14, %s1746_s19  ;;  %768 = vrot.lane.b32.xlu1 %v652_v14, %s1747_s17 }
 0x100   : > { %850 = vrot.lane.b32.xlu0 %v652_v14, %s1748_s18  ;;  %1263 = vmatpush.xpose.msk.msra.mxu3 %vm685_vm1, %v652_v14  ;;  %vm741_vm7 = vcmp.eq.s32.totalorder %v2080_v11, 0 }
 0x103   : > { %1264 = vmatmul.msk.f32.vlgmr.msra.gmra.mxu3 %vm685_vm1, %v621_v15 }
 0x104   : > { %v682_v33 = vpop.f32.mrf.mxu2 }
 0x105   : > { %v2058_v34 = vadd.f32 %v1397_v32, %v682_v33 }
 0x107   : > { %929 = vrot.lane.b32.xlu2 %v621_v15, %s1746_s19  ;;  %766 = vrot.lane.b32.xlu1 %v621_v15, %s1747_s17 }
 0x108   : > { %848 = vrot.lane.b32.xlu0 %v621_v15, %s1748_s18  ;;  %761 = vmatpush.msrb.mxu3 %v2058_v34 }
 0x159   : > { %v932_v22 = vpop.permute.xlu2 %931 }
 0x161   : > { %v930_v26 = vpop.permute.xlu2 %929 }
 0x171   : > { %v769_v21 = vpop.permute.xlu1 %768 }
 0x172   : > { %v851_v23 = vpop.permute.xlu0 %850  ;;  %1266 = vmatpush.xpose.msk.msrb.mxu0 %vm685_vm1, %v769_v21 }
 0x173   : > { %1269 = vmatpush.xpose.msk.msrb.mxu2 %vm685_vm1, %v851_v23 }
 0x176   : > { %1272 = vmatpush.xpose.msk.msra.mxu0 %vm685_vm1, %v932_v22 }
 0x179   : > { %v767_v24 = vpop.permute.xlu1 %766 }
 0x17a   : > { %v849_v25 = vpop.permute.xlu0 %848  ;;  %1267 = vmatmul.msk.f32.vlgmr.msrb.gmra.mxu0 %vm685_vm1, %v767_v24 }
 0x17b   : > { %1270 = vmatmul.msk.f32.vlgmr.msrb.gmra.mxu2 %vm685_vm1, %v849_v25 }
 0x182   : > { %1273 = vmatmul.msk.f32.vlgmr.msra.gmra.mxu0 %vm685_vm1, %v930_v26 }
 0x186   : > { %v709_v28 = vpop.f32.mrf.mxu3 }
 0x187   : > { %v712_v29 = vmul.f32 0.35355338, %v709_v28 }
 0x189   : > { %v714_v30 = vsel %vm713_vm2, -1e+32, %v712_v29 }
 0x18a   : > { %v715_v31 = vsel %vm685_vm1, %v714_v30, -inf }
 0x18b   : > { %716 = vmax.xlane.f32.xlu0 %v715_v31 }
 0x1f7   : > { %v791_v35 = vpop.f32.mrf.mxu0 }
 0x1f8   : > { %v794_v36 = vmul.f32 0.35355338, %v791_v35 }
 0x1fa   : > { %v795_v37 = vsel %vm713_vm2, -1e+32, %v794_v36 }
 0x1fb   : > { %v796_v38 = vsel %vm685_vm1, %v795_v37, -inf }
 0x1fc   : > { %797 = vmax.xlane.f32.xlu1 %v796_v38 }
 0x1fe   : > { %v873_v39 = vpop.f32.mrf.mxu2  ;;  %v717_v40 = vpop.xlane.xlu0 %716 }
 0x1ff   : > { %v876_v41 = vmul.f32 0.35355338, %v873_v39  ;;  %v718_v42 = vsub.f32 %v714_v30, %v717_v40  ;;  %v954_v43 = vpop.f32.mrf.mxu0 }
 0x200   : > { %v957_v47 = vmul.f32 0.35355338, %v954_v43 }
 0x201   : > { %v719_v44 = vmul.f32 1.442695, %v718_v42  ;;  %v877_v45 = vsel %vm713_vm2, -1e+32, %v876_v41 }
 0x202   : > { %v878_v46 = vsel %vm685_vm1, %v877_v45, -inf  ;;  %v958_v48 = vsel %vm713_vm2, -1e+32, %v957_v47 }
 0x203   : > { %1399 = vpow2.f32 %v719_v44  ;;  %879 = vmax.xlane.f32.xlu2 %v878_v46  ;;  %v959_v50 = vsel %vm685_vm1, %v958_v48, -inf }
 0x209   : > { %v1400_v49 = vpop.eup %1399 }
 0x20a   : > { %v721_v51 = vsel %vm685_vm1, %v1400_v49, 0.0 }
 0x20b   : > { %960 = vmax.xlane.f32.xlu2 %v959_v50  ;;  %722 = vadd.xlane.f32.xlu0 %v721_v51 }
 0x26f   : > { %v798_v52 = vpop.xlane.xlu1 %797 }
 0x270   : > { %v799_v53 = vsub.f32 %v795_v37, %v798_v52 }
 0x272   : > { %v800_v54 = vmul.f32 1.442695, %v799_v53 }
 0x274   : > { %1401 = vpow2.f32 %v800_v54 }
 0x276   : > { %v880_v55 = vpop.xlane.xlu2 %879 }
 0x277   : > { %v881_v56 = vsub.f32 %v877_v45, %v880_v55 }
 0x279   : > { %v882_v57 = vmul.f32 1.442695, %v881_v56 }
 0x27a   : > { %v2068_v58 = vpop.eup %1401 }
 0x27b   : > { %1403 = vpow2.f32 %v882_v57  ;;  %v802_v59 = vsel %vm685_vm1, %v2068_v58, 0.0 }
 0x27c   : > { %803 = vadd.xlane.f32.xlu1 %v802_v59 }
 0x27e   : > { %v961_v60 = vpop.xlane.xlu2 %960  ;;  %v723_v61 = vpop.xlane.xlu0 %722 }
 0x27f   : > { %v962_v62 = vsub.f32 %v958_v48, %v961_v60  ;;  %1405 = vrcp.f32 %v723_v61  ;;  %v735_v7 = vand.u32 2147483648, %v723_v61  ;;  %v733_v9 = vand.u32 2147483647, %v723_v61 }
 0x280   : > { %vm729_vm4 = vweird.f32 %v723_v61 }
 0x281   : > { %v2072_v63 = vpop.eup %1403  ;;  %v963_v0 = vmul.f32 1.442695, %v962_v62  ;;  %v736_v13 = vor.u32 1.1754944e-38, %v735_v7  ;;  %vm734_vm6 = vcmp.eq.f32.partialorder %v733_v9, 8.507059e+37 }
 0x282   : > { %v884_v1 = vsel %vm685_vm1, %v2072_v63, 0.0 }
 0x283   : > { %1407 = vpow2.f32 %v963_v0  ;;  %885 = vadd.xlane.f32.xlu2 %v884_v1  ;;  %v1030_v0 = vld [vmem:[#allocation14 + $0x18] sm:$0xff]  ;;  %v1029_v1 = vld [vmem:[#allocation14 + $0x10] sm:$0xff] }
 0x284   : > { %1050 = vmatpush.msra.mxu2 %v1030_v0 }
 0x285   : > { %v1406_v2 = vpop.eup %1405 }
 0x286   : > { %v725_v3 = vmul.f32 %v1406_v2, %v723_v61  ;;  %vm730_vm3 = vweird.f32 %v1406_v2  ;;  %1051 = vmatpush.msra.mxu2 %v1029_v1 }
 0x287   : > { %vm731_vm5 = vmor %vm729_vm4, %vm730_vm3 }
 0x288   : > { %v726_v5 = vsub.f32 1.0, %v725_v3  ;;  %v1027_v3 = vld [vmem:[#allocation14] sm:$0xff] }
 0x289   : > { %v2076_v6 = vpop.eup %1407 }
 0x28a   : > { %v727_v8 = vmul.f32 %v1406_v2, %v726_v5  ;;  %v965_v10 = vsel %vm685_vm1, %v2076_v6, 0.0 }
 0x28b   : > { %966 = vadd.xlane.f32.xlu0 %v965_v10  ;;  %v1398_v10 = vld [vmem:[%s2204_s30] ss:$0 sm:$0xff] }
 0x28c   : > { %v728_v12 = vadd.f32 %v1406_v2, %v727_v8 }
 0x28e   : > { %v732_v14 = vsel %vm731_vm5, %v1406_v2, %v728_v12  ;;  %v1028_v2 = vld [vmem:[#allocation14 + $0x8] sm:$0xff] }
 0x28f   : > { %v737_v15 = vsel %vm734_vm6, %v736_v13, %v732_v14  ;;  %1052 = vmatpush.msra.mxu2 %v1028_v2  ;;  %vm1023_vm6 = vcmask 130048  }
 0x290   : > { %v738_v16 = vmul.f32 %v1400_v49, %v737_v15 }
 0x291   : > { %1053 = vmatpush.msra.mxu2 %v1027_v3 }
 0x292   : > { %v742_v17 = vsel %vm741_vm7, 0.0, %v738_v16 }
 0x293   : > { %1265 = vmatmul.msk.f32.vlgmr.msrb.gmra.mxu3 %vm685_vm1, %v742_v17 }
 0x295   : > { %822 = vrot.lane.b32.xlu1 %v2058_v34, %s1747_s17  ;;  %s1060_s17 = scalar_lea.sflag [#allocation4], %s1996_s14 }
 0x29b   : > { %903 = vrot.lane.b32.xlu2 %v2058_v34, %s1748_s18 }
 0x29f   : > { %984 = vrot.lane.b32.xlu0 %v2058_v34, %s1746_s19  ;;  %s1074_s19 = sshll.u32 %s1070_s16, 4  ;;  %s1075_s19 = int_to_ptr.hbm [resolvable:$true] %s1074_s19 }
 0x2a0   : > { %s1669_s28 = sshra.s32 %s1075_s19, 4  ;;  %s1670_s28 = int_to_ptr.hbm [resolvable:$true] %s1669_s28 }
 0x2a1   : > { %s1671_s18 = scalar_lea.hbm %s1670_s28, 8  ;;  %p1676_p6 = scmp.lt.s32.totalorder %s1670_s28, %s2202_s29 }
 0x2a2   : > { %p1672_p12 = scmp.ne.s32.totalorder %s1670_s28, %s1671_s18  ;;  %p1677_p11 = scmp.lt.s32.totalorder %s1675_s15, %s1671_s18 }
 0x2a4   : > { %p1673_p8 = pnand %p1672_p12, %p1893_p5  ;;  %p1678_p13 = por %p1677_p11, %p1676_p6 }
 0x2a6   : > { %p1674_p10 = pneg %p1673_p8 }
 0x2a8   : > { %p1679_p3 = pnand %p1678_p13, %p1674_p10 }
 0x2ef   : > { %v804_v18 = vpop.xlane.xlu1 %803 }
 0x2f0   : > { %1409 = vrcp.f32 %v804_v18  ;;  %v816_v24 = vand.u32 2147483648, %v804_v18  ;;  %v814_v25 = vand.u32 2147483647, %v804_v18  ;;  %vm810_vm9 = vweird.f32 %v804_v18 }
 0x2f2   : > { %v817_v31 = vor.u32 1.1754944e-38, %v816_v24  ;;  %vm815_vm11 = vcmp.eq.f32.partialorder %v814_v25, 8.507059e+37 }
 0x2f6   : > { %v1410_v19 = vpop.eup %1409  ;;  %v886_v20 = vpop.xlane.xlu2 %885 }
 0x2f7   : > { %v806_v21 = vmul.f32 %v1410_v19, %v804_v18  ;;  %1411 = vrcp.f32 %v886_v20  ;;  %vm811_vm8 = vweird.f32 %v1410_v19  ;;  %v898_v34 = vand.u32 2147483648, %v886_v20 }
 0x2f8   : > { %vm812_vm10 = vmor %vm810_vm9, %vm811_vm8  ;;  %v896_v37 = vand.u32 2147483647, %v886_v20  ;;  %vm892_vm13 = vweird.f32 %v886_v20 }
 0x2f9   : > { %v807_v22 = vsub.f32 1.0, %v806_v21  ;;  %v899_v41 = vor.u32 1.1754944e-38, %v898_v34 }
 0x2fa   : > { %vm897_vm15 = vcmp.eq.f32.partialorder %v896_v37, 8.507059e+37 }
 0x2fb   : > { %v808_v23 = vmul.f32 %v1410_v19, %v807_v22 }
 0x2fd   : > { %v1412_v26 = vpop.eup %1411  ;;  %v809_v27 = vadd.f32 %v1410_v19, %v808_v23 }
 0x2fe   : > { %v888_v28 = vmul.f32 %v1412_v26, %v886_v20  ;;  %v904_v29 = vpop.permute.xlu2 %903  ;;  %v967_v30 = vpop.xlane.xlu0 %966  ;;  %vm893_vm12 = vweird.f32 %v1412_v26 }
 0x2ff   : > { %1413 = vrcp.f32 %v967_v30  ;;  %924 = vmatpush.msra.mxu3 %v904_v29  ;;  %v813_v33 = vsel %vm812_vm10, %v1410_v19, %v809_v27  ;;  %vm894_vm14 = vmor %vm892_vm13, %vm893_vm12  ;;  %v979_v49 = vand.u32 2147483648, %v967_v30  ;;  %v977_v51 = vand.u32 2147483647, %v967_v30 }
 0x300   : > { %v889_v32 = vsub.f32 1.0, %v888_v28  ;;  %v818_v35 = vsel %vm815_vm11, %v817_v31, %v813_v33  ;;  %vm973_vm3 = vweird.f32 %v967_v30 }
 0x301   : > { %v819_v39 = vmul.f32 %v2068_v58, %v818_v35  ;;  %v980_v54 = vor.u32 1.1754944e-38, %v979_v49  ;;  %vm978_vm5 = vcmp.eq.f32.partialorder %v977_v51, 8.507059e+37 }
 0x302   : > { %v890_v36 = vmul.f32 %v1412_v26, %v889_v32 }
 0x303   : > { %v820_v47 = vsel %vm741_vm7, 0.0, %v819_v39 }
 0x304   : > { %v891_v38 = vadd.f32 %v1412_v26, %v890_v36 }
 0x305   : > { %v1414_v40 = vpop.eup %1413 }
 0x306   : > { %v969_v42 = vmul.f32 %v1414_v40, %v967_v30  ;;  %v895_v43 = vsel %vm894_vm14, %v1412_v26, %v891_v38  ;;  %vm974_vm2 = vweird.f32 %v1414_v40 }
 0x307   : > { %v823_v44 = vpop.permute.xlu1 %822  ;;  %v900_v45 = vsel %vm897_vm15, %v899_v41, %v895_v43  ;;  %vm975_vm4 = vmor %vm973_vm3, %vm974_vm2 }
 0x308   : > { %v970_v46 = vsub.f32 1.0, %v969_v42  ;;  %843 = vmatpush.msrb.mxu1 %v823_v44  ;;  %v901_v48 = vmul.f32 %v2072_v63, %v900_v45 }
 0x309   : > { %1268 = vmatmul.msk.f32.vlgmr.msrb.gmra.mxu1 %vm685_vm1, %v820_v47 }
 0x30a   : > { %v971_v50 = vmul.f32 %v1414_v40, %v970_v46  ;;  %v902_v52 = vsel %vm741_vm7, 0.0, %v901_v48 }
 0x30b   : > { %1271 = vmatmul.msk.f32.vlgmr.msra.gmra.mxu3 %vm685_vm1, %v902_v52 }
 0x30c   : > { %v972_v53 = vadd.f32 %v1414_v40, %v971_v50 }
 0x30e   : > { %v976_v55 = vsel %vm975_vm4, %v1414_v40, %v972_v53 }
 0x30f   : > { %v981_v56 = vsel %vm978_vm5, %v980_v54, %v976_v55 }
 0x310   : > { %v982_v57 = vmul.f32 %v2076_v6, %v981_v56 }
 0x311   : > { %v985_v58 = vpop.permute.xlu0 %984 }
 0x312   : > { %1005 = vmatpush.msra.mxu1 %v985_v58  ;;  %v983_v59 = vsel %vm741_vm7, 0.0, %v982_v57  ;;  %vm1025_vm7 = vcmask 195584  }
 0x313   : > { %1274 = vmatmul.msk.f32.vlgmr.msra.gmra.mxu1 %vm685_vm1, %v983_v59 }
 0x316   : > { %v763_v60 = vpop.f32.mrf.mxu3 }
 0x386   : > { %v845_v61 = vpop.f32.mrf.mxu1 }
 0x387   : > { %1011 = vrot.lane.b32.xlu1 %v845_v61, %s1749_s3 }
 0x38e   : > { %v926_v62 = vpop.f32.mrf.mxu3 }
 0x38f   : > { %1015 = vrot.lane.b32.xlu0 %v926_v62, %s1750_s27 }
 0x390   : > { %v1007_v63 = vpop.f32.mrf.mxu1 }
 0x391   : > { %1019 = vrot.lane.b32.xlu2 %v1007_v63, %s1751_s26 }
 0x3eb   : > { %v1020_v7 = vpop.permute.xlu2 %1019 }
 0x3f9   : > { %v1012_v4 = vpop.permute.xlu1 %1011 }
 0x3fa   : > { %v1022_v5 = vsel %vm685_vm1, %v763_v60, %v1012_v4 }
 0x401   : > { %v1016_v6 = vpop.permute.xlu0 %1015 }
 0x402   : > { %v1024_v8 = vsel %vm1023_vm6, %v1022_v5, %v1016_v6 }
 0x403   : > { %v1026_v9 = vsel %vm1025_vm7, %v1024_v8, %v1020_v7 }
 0x404   : > { %1275 = vmatmul.msk.f32.vlgmr.msra.gmra.mxu2 %vm599_vm0, %v1026_v9 }
 0x487   : > { %v1055_v11 = vpop.f32.mrf.mxu2 }
 0x488   : > { %v1056_v12 = vadd.f32 %v1398_v10, %v1055_v11 }
 0x48a   : > { %1058 = vst.msk [vmem:[%s586_s11] sm:$0xff] %vm599_vm0, %v1056_v12 }
 0x48b   : > { %1682 = shalt.err (!%p1679_p3)
}
 0x48c   : > { %1306 = dma.vmem_to_hbm [thread:$0]  (%p1893_p5), %s1073_s21, 128, %s1075_s19, %s1060_s17  }
 0x48d PF: > { %s2205_s14 = sld [smem:[#allocation23_spill]] }
 0x48e   : > { %s2207_s5 = sld [smem:[#allocation24_spill]] }
 0x493   : > { %s1086_s1 = sand.u32 1, %s2205_s14  }
 0x494   : > { %p2208_p7 = scmp.ge.s32.totalorder %s2207_s5, 2  ;;  %s1087_s25 = scalar_lea.sflag [#allocation4], %s1086_s1 }
 0x496   : > { %p1335_p9 = pnand %p2208_p7, %p1897_p4 }
 0x498   : > { %p1336_p0 = pneg %p1335_p9 }
 0x49a   : > { %1720 = dma.done.wait (%p1336_p0), %s1087_s25, 128  }
 0x49b   : > { %1722 = vsyncadd (%p1336_p0), %s1087_s25, 4294967168  ;;  %s2209_s24 = sld [smem:[#allocation25_spill]]  ;;  %s2211_s21 = smov %s1729_s22 }
 0x49c   : > { %s2210_s16 = sld [smem:[#allocation26_spill]]  ;;  %s2212_s22 = smov %s1733_s23 }
 0x4a1   : > { %p31_p2 = scmp.ge.s32.totalorder %s2209_s24, 4  }
 0x4a2   : > { %s2213_s23 = smov %s2210_s16 }
 0x4a3   :  { %33 = sbr.rel (!%p31_p2) target bundleno = 17 (0x11), region = 157 }
 0x4a8   :  { %1093 = vsyncpa [#allocation3], 1 }
 0x4a9   :  { %1095 = vsyncpa [#allocation3 + $0x1], 1 }
 0x4aa   :  { %1096 = vsyncpa [#allocation6], 1 }
 0x4ab   :  { %1098 = vsyncpa [#allocation6 + $0x1], 1 }
 0x4ac   :  { %1099 = vsyncpa [#allocation9], 1 }
 0x4ad   :  { %1100 = vsyncpa [#allocation12], 1 }
 0x4ae   :  { %1101 = vsyncpa [#allocation15], 1 }
 0x4af   :  { %1102 = vsyncpa [#allocation4], 1 }
 0x4b0   :  { %1104 = vsyncpa [#allocation4 + $0x1], 1 }

</bundles_post_ra>
